<compile_context>
chip_gen: v7x
topology: tpu7x:2x2x1
jax: 0.10.0
libtpu: 0.0.40
codegen_flags: <defaults>
</compile_context>

<pallas_src>
import math

import jax
import jax.numpy as jnp
from jax.experimental import pallas as pl
from jax.experimental.pallas import tpu as pltpu

# Module "parameter" (matches nn.Module __init__ default). Only feeds dead code.
WEIGHT_MULTIPLIER = 10.0
# TODO(synk): the reference also computes
#   error = matmul(squared_error, (weight_multiplier - 1) * target[:, 0]) + squared_error
# but never uses it (dead code); it is intentionally not materialized here.


def _cdiv(a: int, b: int) -> int:
    return -(-a // b)


def _round_up(x: int, m: int) -> int:
    return ((x + m - 1) // m) * m


def _make_wmse_kernel(block_rows: int, width: int, valid_rows: int, needs_mask: bool):
    """Build the kernel: elementwise accumulate (pred - target)^2, reduce once."""

    def kernel(pred_ref, target_ref, out_ref, acc_ref):
        step = pl.program_id(0)

        @pl.when(step == 0)
        def _():
            acc_ref[...] = jnp.zeros_like(acc_ref)

        # Upcast inside the kernel (inputs stay in native dtype in HBM).
        p = pred_ref[...].astype(jnp.float32)
        t = target_ref[...].astype(jnp.float32)
        d = p - t
        d2 = d * d
        if needs_mask:
            # Rows past `valid_rows` in the final (partial) block hold stale
            # VMEM data; drop them with a select (safe even if they are NaN/Inf).
            row = jax.lax.broadcasted_iota(jnp.int32, (block_rows, width), 0)
            d2 = jnp.where(step * block_rows + row < valid_rows, d2, 0.0)
        acc_ref[...] += d2  # pure VPU elementwise; no per-step reduction

        @pl.when(step == pl.num_programs(0) - 1)
        def _():
            # Single full reduction in the epilogue only.
            out_ref[...] = jnp.broadcast_to(jnp.sum(acc_ref[...]), out_ref.shape)

    return kernel


def weighted_mse_loss(
    pred: jax.Array,
    target: jax.Array,
    *,
    max_block_rows: int | None = None,          # optional cap (used by tests)
    target_block_bytes: int = 4 * 1024 * 1024,  # ~4 MiB per input block
) -> jax.Array:
    assert pred.shape == target.shape
    total = math.prod(pred.shape) if pred.ndim > 0 else 1
    assert total > 0

    # ---- choose a copy-free 2-D view -----------------------------------------
    # Prefer a lane-dense width (512/256/128) when it divides the element count;
    # otherwise fall back to the native last dim used as a full-extent block dim.
    width = None
    for cand in (512, 256, 128):
        if total % cand == 0:
            width = cand
            break
    if width is None:
        width = pred.shape[-1] if pred.ndim >= 2 else total
    rows = total // width                     # exact by construction
    width_padded = _round_up(width, 128)      # VMEM lane padding (footprint calc)

    # ---- block sizing ---------------------------------------------------------
    rows_budget = max(8, (target_block_bytes // (width_padded * 4)) // 8 * 8)
    if max_block_rows is not None:
        rows_budget = max(8, min(rows_budget, (max_block_rows // 8) * 8))

    if rows <= rows_budget:
        block_rows = rows                     # full extent: no mask needed
        needs_mask = False
    else:
        nb = _cdiv(rows, rows_budget)
        block_rows = _round_up(_cdiv(rows, nb), 8)   # last block nearly full
        needs_mask = (rows % block_rows) != 0
    grid_rows = _cdiv(rows, block_rows)

    pred2 = pred.reshape(rows, width)         # free, row-major relabel
    target2 = target.reshape(rows, width)

    # ---- VMEM budget / cost hint ----------------------------------------------
    itemsize = pred.dtype.itemsize
    in_block_bytes = block_rows * width_padded * itemsize
    acc_block_bytes = block_rows * width_padded * 4
    footprint = 4 * in_block_bytes + acc_block_bytes     # 2 inputs x 2 bufs + acc
    # Default config is ~20 MiB; keep the limit well below v7x's 64 MiB physical.
    vmem_limit = max(32 * 1024 * 1024, footprint + 4 * 1024 * 1024)

    cost = pl.CostEstimate(
        flops=3 * total,
        transcendentals=0,
        bytes_accessed=2 * total * itemsize + 8 * 128 * 4,
    )

    partial = pl.pallas_call(
        _make_wmse_kernel(block_rows, width, rows, needs_mask),
        out_shape=jax.ShapeDtypeStruct((8, 128), jnp.float32),
        grid_spec=pltpu.PrefetchScalarGridSpec(
            num_scalar_prefetch=0,
            grid=(grid_rows,),
            in_specs=[
                pl.BlockSpec((block_rows, width), lambda i: (i, 0)),
                pl.BlockSpec((block_rows, width), lambda i: (i, 0)),
            ],
            out_specs=pl.BlockSpec((8, 128), lambda i: (0, 0)),
            scratch_shapes=[pltpu.VMEM((block_rows, width), jnp.float32)],
        ),
        compiler_params=pltpu.CompilerParams(
            dimension_semantics=("arbitrary",),   # single reduction axis
            vmem_limit_bytes=vmem_limit,
        ),
        cost_estimate=cost,
    )(pred2, target2)

    # Mean divisor uses the original element count.
    return partial[0, 0] * jnp.float32(1.0 / total)


if __name__ == "__main__":
    key = jax.random.PRNGKey(0)
    kp, kt = jax.random.split(key)

    # Square shapes, consistent with the module's forward (the dead matmul
    # path would require square pred/target).
    B = 16
    pred = jax.random.normal(kp, (B, B), dtype=jnp.float32)
    target = jax.random.normal(kt, (B, B), dtype=jnp.float32)
    loss = jax.block_until_ready(weighted_mse_loss(pred, target))
    ref = jnp.mean((pred - target) ** 2)
    assert jnp.allclose(loss, ref, rtol=1e-5, atol=1e-6), (loss, ref)

    # Non-128-aligned shape: exercises the native-width, full-extent-block path
    # (no padding, no copies).
    kp2, kt2 = jax.random.split(kt)
    pred2 = jax.random.normal(kp2, (50, 50), dtype=jnp.float32)
    target2 = jax.random.normal(kt2, (50, 50), dtype=jnp.float32)
    loss2 = jax.block_until_ready(weighted_mse_loss(pred2, target2))
    ref2 = jnp.mean((pred2 - target2) ** 2)
    assert jnp.allclose(loss2, ref2, rtol=1e-5, atol=1e-6), (loss2, ref2)

    # Multi-step grid with a partial (masked) last block; small block size
    # forced so the test stays tiny.
    kp3, kt3 = jax.random.split(kt2)
    pred3 = jax.random.normal(kp3, (304, 304), dtype=jnp.float32)
    target3 = jax.random.normal(kt3, (304, 304), dtype=jnp.float32)
    loss3 = jax.block_until_ready(
        weighted_mse_loss(pred3, target3, max_block_rows=128))
    ref3 = jnp.mean((pred3 - target3) ** 2)
    assert jnp.allclose(loss3, ref3, rtol=1e-5, atol=1e-6), (loss3, ref3)

    print("KERNEL_OK")
</pallas_src>

<mosaic_0001>
module attributes {stable_mosaic.version = 11 : i64} {
  func.func @kernel(%arg0: i32, %arg1: memref<1x256xf32, #tpu.memory_space<vmem>>, %arg2: memref<1x256xf32, #tpu.memory_space<vmem>>, %arg3: memref<8x128xf32, #tpu.memory_space<vmem>>, %arg4: memref<1x256xf32, #tpu.memory_space<vmem>>) attributes {dimension_semantics = [#tpu.dimension_semantics<arbitrary>], iteration_bounds = array<i64: 1>, scalar_prefetch = 0 : i64, scratch_operands = 1 : i64, tpu.core_type = #tpu.core_type<tc>, window_params = [{transform_indices = @transform_0, window_bounds = array<i64: 1, 256>}, {transform_indices = @transform_1, window_bounds = array<i64: 1, 256>}, {pipeline_mode = #tpu.pipeline_mode<synchronous>, transform_indices = @transform_2, window_bounds = array<i64: 8, 128>}]} {
    %c0_i32 = arith.constant 0 : i32
    %0 = arith.cmpi eq, %arg0, %c0_i32 : i32
    %1 = arith.extui %0 : i1 to i32
    %c0_i32_0 = arith.constant 0 : i32
    %2 = arith.cmpi ne, %1, %c0_i32_0 : i32
    scf.if %2 {
      %cst = arith.constant 0.000000e+00 : f32
      %13 = vector.broadcast %cst : f32 to vector<1x256xf32>
      %c0_10 = arith.constant 0 : index
      %c0_11 = arith.constant 0 : index
      %14 = vector.load %arg4[%c0_10, %c0_11] : memref<1x256xf32, #tpu.memory_space<vmem>>, vector<1x256xf32>
      tpu.vector_store %arg4[%c0_10, %c0_11], %13 {strides = array<i32>} : memref<1x256xf32, #tpu.memory_space<vmem>>, vector<1x256xf32>,
    } else {
    }
    %c0 = arith.constant 0 : index
    %c0_1 = arith.constant 0 : index
    %3 = vector.load %arg1[%c0, %c0_1] : memref<1x256xf32, #tpu.memory_space<vmem>>, vector<1x256xf32>
    %c0_2 = arith.constant 0 : index
    %c0_3 = arith.constant 0 : index
    %4 = vector.load %arg2[%c0_2, %c0_3] : memref<1x256xf32, #tpu.memory_space<vmem>>, vector<1x256xf32>
    %5 = arith.subf %3, %4 : vector<1x256xf32>
    %6 = arith.mulf %5, %5 : vector<1x256xf32>
    %c0_4 = arith.constant 0 : index
    %c0_5 = arith.constant 0 : index
    %7 = vector.load %arg4[%c0_4, %c0_5] : memref<1x256xf32, #tpu.memory_space<vmem>>, vector<1x256xf32>
    %8 = arith.addf %7, %6 : vector<1x256xf32>
    %c0_6 = arith.constant 0 : index
    %c0_7 = arith.constant 0 : index
    %9 = vector.load %arg4[%c0_6, %c0_7] : memref<1x256xf32, #tpu.memory_space<vmem>>, vector<1x256xf32>
    tpu.vector_store %arg4[%c0_6, %c0_7], %8 {strides = array<i32>} : memref<1x256xf32, #tpu.memory_space<vmem>>, vector<1x256xf32>,
    %c0_i32_8 = arith.constant 0 : i32
    %10 = arith.cmpi eq, %arg0, %c0_i32_8 : i32
    %11 = arith.extui %10 : i1 to i32
    %c0_i32_9 = arith.constant 0 : i32
    %12 = arith.cmpi ne, %11, %c0_i32_9 : i32
    scf.if %12 {
      %c0_10 = arith.constant 0 : index
      %c0_11 = arith.constant 0 : index
      %13 = vector.load %arg4[%c0_10, %c0_11] : memref<1x256xf32, #tpu.memory_space<vmem>>, vector<1x256xf32>
      %14 = vector.shape_cast %13 : vector<1x256xf32> to vector<1x1x256xf32>
      %cst = arith.constant dense<0.000000e+00> : vector<1xf32>
      %15 = vector.multi_reduction <add>, %14, %cst [1, 2] : vector<1x1x256xf32> to vector<1xf32>
      %16 = vector.shape_cast %15 : vector<1xf32> to vector<1x1x1xf32>
      %17 = vector.extract %16[0, 0, 0] : f32 from vector<1x1x1xf32>
      %18 = vector.broadcast %17 : f32 to vector<8x128xf32>
      %c0_12 = arith.constant 0 : index
      %c0_13 = arith.constant 0 : index
      %19 = vector.load %arg3[%c0_12, %c0_13] : memref<8x128xf32, #tpu.memory_space<vmem>>, vector<8x128xf32>
      tpu.vector_store %arg3[%c0_12, %c0_13], %18 {strides = array<i32>} : memref<8x128xf32, #tpu.memory_space<vmem>>, vector<8x128xf32>,
    } else {
    }
    return
  }
  func.func @transform_0(%arg0: i32) -> (i32, i32) {
    %c0_i32 = arith.constant 0 : i32
    %c0_i32_0 = arith.constant 0 : i32
    return %arg0, %c0_i32 : i32, i32
  }
  func.func @transform_1(%arg0: i32) -> (i32, i32) {
    %c0_i32 = arith.constant 0 : i32
    %c0_i32_0 = arith.constant 0 : i32
    return %arg0, %c0_i32 : i32, i32
  }
  func.func @transform_2(%arg0: i32) -> (i32, i32) {
    %c0_i32 = arith.constant 0 : i32
    %c0_i32_0 = arith.constant 0 : i32
    %c0_i32_1 = arith.constant 0 : i32
    return %c0_i32, %c0_i32_0 : i32, i32
  }
}

</mosaic_0001>

<bundles_post_ra>
// kernel: tpu_custom_call.1
= control target key start
LH: loop header
LB: loop body
LE: loop exit
PB: predicated region body
PF: predicated region fallthrough
CT: control target
= control target key end

     0   :  { %7 = vsyncpa [#allocation4], 0  ;;  %s187_s0 = inlined_call_operand.hbm [shape: f32[1,256], index: 0, kind: input, shape index: {}]   ;;  %s188_s1 = inlined_call_operand.vmem [shape: f32[1,256], index: 1, kind: input, shape index: {}]   ;;  %s189_s2 = inlined_call_operand.hbm [shape: f32[8,128], index: 2, kind: output, shape index: {}]  }
   0x1   :  { %8 = vsyncpa [#allocation5], 0  ;;  %s142_s9 = smov [#allocation3]   ;;  %s94_s13 = scalar_lea.hbm %s187_s0, 32 }
   0x2   :  { %s15_s10 = sshll.u32 %s142_s9, 4  ;;  %p95_p0 = scmp.ne.s32.totalorder %s187_s0, %s94_s13  ;;  %s16_s10 = int_to_ptr.vmem [resolvable:$true] %s15_s10 }
   0x3   :  { %p98_p1 = scmp.lt.u32.totalorder %s94_s13, %s187_s0 }
   0x5   :  { %p100_p2 = pnand %p98_p1, %p95_p0 }
   0x7   :  { %103 = shalt.err (!%p100_p2)
}
   0x8   :  { %s104_s18 = scalar_lea.vmem %s16_s10, 32  ;;  %p109_p4 = scmp.lt.s32.totalorder %s16_s10, %s16_s10 }
   0x9   :  { %p105_p3 = scmp.ne.s32.totalorder %s16_s10, %s104_s18  ;;  %p110_p5 = scmp.lt.s32.totalorder %s104_s18, %s104_s18 }
   0xb   :  { %p111_p6 = por %p110_p5, %p109_p4 }
   0xd   :  { %p112_p7 = pnand %p111_p6, %p105_p3 }
   0xf   :  { %115 = shalt.err (!%p112_p7)
}
  0x10   :  { %18 = dma.hbm_to_vmem [thread:$0]  %s187_s0, 32, %s16_s10, [#allocation4]  }
  0x11   :  { %138 = dma.done.wait [#allocation4], 32  }
  0x12   :  { %139 = vsyncadd [#allocation4], 4294967264  ;;  %v28_v0 = vlaneseq  ;;  %v143_v1 = vmov 0.0   ;;  %v33_v2 = vld [vmem:[#allocation3] sm:$0x3]  ;;  %vm59_vm1 = vcmask 1040384  }
  0x13   :  { %v34_v3 = vld [vmem:[%s188_s1] sm:$0x3]  ;;  %s144_s0 = smov [#allocation6]  }
  0x14   :  { %vm30_vm0 = vcmp.lt.s32.totalorder %v28_v0, 256  ;;  %v35_v4 = vsub.f32 %v33_v2, %v34_v3  ;;  %v50_v8 = vshrl.u32 %v28_v0, 7  ;;  %s80_s1 = sshll.u32 %s144_s0, 4  ;;  %s81_s1 = int_to_ptr.vmem [resolvable:$true] %s80_s1 }
  0x15   :  { %32 = vst.msk [vmem:[#allocation2] sm:$0x3] %vm30_vm0, %v143_v1  ;;  %s116_s24 = scalar_lea.vmem %s81_s1, 128  ;;  %p121_p9 = scmp.lt.s32.totalorder %s81_s1, %s81_s1 }
  0x16   :  { %v36_v5 = vmul.f32 %v35_v4, %v35_v4  ;;  %v51_v9 = vsub.s32 0, %v50_v8  ;;  %v55_v10 = vsub.s32 1, %v50_v8  ;;  %p117_p8 = scmp.ne.s32.totalorder %s81_s1, %s116_s24  ;;  %p122_p10 = scmp.lt.s32.totalorder %s116_s24, %s116_s24 }
  0x18   :  { %p123_p11 = por %p122_p10, %p121_p9 }
  0x1a   :  { %p124_p12 = pnand %p123_p11, %p117_p8 }
  0x1c   :  { %v37_v6 = vld [vmem:[#allocation2] sm:$0x3] }
  0x1d   :  { %v38_v7 = vadd.f32 %v37_v6, %v36_v5 }
  0x1f   :  { %43 = vst.msk [vmem:[#allocation2] sm:$0x3] %vm30_vm0, %v38_v7 }
  0x26   :  { %v47_v11 = vld [vmem:[#allocation2] sm:$0x3] }
  0x27   :  { %v52_v12 = vrot.slane %v47_v11, %v51_v9  ;;  %v56_v13 = vrot.slane %v47_v11, %v55_v10 }
  0x29   :  { %v60_v14 = vsel %vm59_vm1, %v52_v12, 0.0  ;;  %v61_v15 = vsel %vm59_vm1, %v56_v13, 0.0 }
  0x2a   :  { %v62_v16 = vadd.f32 %v61_v15, %v60_v14 }
  0x2c   :  { %63 = vadd.xlane.f32.xlu0 %v62_v16 }
  0xb9   :  { %v64_v17 = vpop.xlane.xlu0 %63 }
  0xba   :  { %v65_v18 = vrot.slane %v64_v17, 4 }
  0xbc   :  { %v66_v19 = vadd.f32 %v65_v18, %v64_v17 }
  0xbe   :  { %v67_v20 = vrot.slane %v66_v19, 2 }
  0xc0   :  { %v68_v21 = vadd.f32 %v67_v20, %v66_v19 }
  0xc2   :  { %v69_v22 = vrot.slane %v68_v21, 1 }
  0xc4   :  { %v70_v23 = vadd.f32 %v69_v22, %v68_v21 }
  0xc6   :  { %89 = vpush %v70_v23 }
  0xf7   :  { %s90_s23 = spop %89 }
  0xf8   :  { %v72_v24 = vstv %s90_s23 }
  0xf9   :  { %73 = vst [vmem:[#allocation6] sm:$0xff] %v72_v24 }
  0xfa   :  { %127 = shalt.err (!%p124_p12)
}
  0xfb   :  { %s128_s27 = scalar_lea.hbm %s189_s2, 128 }
  0xfc   :  { %p129_p13 = scmp.ne.s32.totalorder %s189_s2, %s128_s27  ;;  %p132_p0 = scmp.lt.u32.totalorder %s128_s27, %s189_s2 }
  0xfe   :  { %p134_p1 = pnand %p132_p0, %p129_p13 }
 0x100   :  { %137 = shalt.err (!%p134_p1)
}
 0x101   :  { %83 = dma.vmem_to_hbm [thread:$0]  %s81_s1, 128, %s189_s2, [#allocation5]  }
 0x102   :  { %140 = dma.done.wait [#allocation5], 128  }
 0x103   :  { %141 = vsyncadd [#allocation5], 4294967168 }
 0x104   :  { %87 = vsyncpa [#allocation4], 1 }
 0x105   :  { %88 = vsyncpa [#allocation5], 1 }

</bundles_post_ra>
